<compile_context>
chip_gen: v7x
topology: tpu7x:2x2x1
jax: 0.10.0
libtpu: 0.0.40
codegen_flags: <defaults>
</compile_context>

<pallas_src>
from functools import partial

import jax
import jax.numpy as jnp
from jax import lax
from jax.experimental import pallas as pl
from jax.experimental.pallas import tpu as pltpu


# ---------------------------------------------------------------------------
# Pass 1: per-image K/V projection + 2x2 max-pool + channel gate.
# ---------------------------------------------------------------------------
def _preamble_kernel(N4, x_ref, wk_ref, bk_ref, wv_ref, bv_ref,
                     w1_ref, w2_ref, kp_ref, vp_ref, gate_ref):
    x = x_ref[0]                                                  # (N, C) bf16

    # K / V 1x1-conv projections (bf16 MXU inputs, f32 accumulation).
    k = jnp.dot(x, wk_ref[...], preferred_element_type=jnp.float32) + bk_ref[...]
    v = jnp.dot(x, wv_ref[...], preferred_element_type=jnp.float32) + bv_ref[...]

    # 2x2 max-pool: the wrapper's window-major flattening puts the 4 members
    # of every pooling window at rows {p, p+N4, p+2N4, p+3N4}.
    kp = jnp.maximum(jnp.maximum(k[:N4], k[N4:2 * N4]),
                     jnp.maximum(k[2 * N4:3 * N4], k[3 * N4:]))
    vp = jnp.maximum(jnp.maximum(v[:N4], v[N4:2 * N4]),
                     jnp.maximum(v[2 * N4:3 * N4], v[3 * N4:]))
    kp_ref[0] = kp.astype(kp_ref.dtype)                           # (N4, C8) bf16
    vp_ref[0] = vp.astype(vp_ref.dtype)                           # (N4, C2) bf16

    # Channel gate: sigmoid(W2 relu(W1 avgpool(x))) -- tiny, f32 math.
    y = jnp.mean(x.astype(jnp.float32), axis=0, keepdims=True)    # (1, C)
    h1 = jnp.maximum(
        jnp.dot(y, w1_ref[...], preferred_element_type=jnp.float32), 0.0)
    z = jnp.dot(h1, w2_ref[...], preferred_element_type=jnp.float32)
    gate_ref[0] = 1.0 / (1.0 + jnp.exp(-z))                       # (1, C)


# ---------------------------------------------------------------------------
# Pass 2: attention over query tiles (both grid axes parallel).
# ---------------------------------------------------------------------------
def _attn_kernel(x_ref, kpt_ref, vp_ref, gate_ref, wq_ref, bq_ref,
                 wo_ref, bo_ref, gamma_ref, o_ref):
    x_tile = x_ref[0]                                             # (TQ, C) bf16

    # Per-tile Q projection (no whole-image Q scratch).
    q = jnp.dot(x_tile, wq_ref[...],
                preferred_element_type=jnp.float32) + bq_ref[...]  # (TQ, C8)

    # energy[n, p] = q[n] . k_pooled[p]; pooled K arrives pre-transposed.
    energy = jnp.dot(q.astype(jnp.bfloat16), kpt_ref[0],
                     preferred_element_type=jnp.float32)          # (TQ, N4)

    emax = jnp.max(energy, axis=-1, keepdims=True)
    p = jnp.exp(energy - emax)
    denom = jnp.sum(p, axis=-1, keepdims=True)

    # Value matmul first, softmax normalization applied to the small result.
    out_sp = jnp.dot(p.astype(jnp.bfloat16), vp_ref[0],
                     preferred_element_type=jnp.float32)          # (TQ, C2)
    out_sp = out_sp * pl.reciprocal(denom, approx=True)

    out2 = jnp.dot(out_sp.astype(jnp.bfloat16), wo_ref[...],
                   preferred_element_type=jnp.float32) + bo_ref[...]   # (TQ, C)

    o_ref[0] = gamma_ref[0, 0] * out2 + x_tile.astype(jnp.float32) * gate_ref[0]


def _clamp_vmem(nbytes):
    # Compiler VMEM-limit hint computed from buffer sizes; clamped so small
    # shapes still get a sane budget.  (On v7x, 64 MiB physical, one would cap
    # nearer ~56 MiB.)
    return int(min(max(nbytes, 16 * 2**20), 100 * 2**20))


def chanelspace_attn_pallas(x_nchw, params, tq=None):
    B, C, W, H = x_nchw.shape
    assert C % 8 == 0, "in_dim must be divisible by 8"
    assert W % 2 == 0 and H % 2 == 0, "MaxPool2d(2) needs even spatial dims"
    N = W * H
    assert N % 32 == 0, "N % 32 == 0 keeps pooling row-slices sublane-aligned"
    N4 = N // 4
    C8, C2 = C // 8, C // 2

    # Query-tile size: largest of {1024, 512, 256, 128} dividing N, else N.
    if tq is None:
        tq = N
        for cand in (1024, 512, 256, 128):
            if N % cand == 0:
                tq = cand
                break
    assert N % tq == 0 and (tq == N or tq % 8 == 0)
    NQ = N // tq

    f32, bf16 = jnp.float32, jnp.bfloat16

    # 2x2-window-major flattening, folded into the mandatory NCHW->(N, C)
    # relayout together with the bf16 cast:
    #   n' = (i%2 * 2 + j%2) * (N/4) + (i//2)*(H//2) + (j//2)
    xc = jnp.transpose(x_nchw, (0, 2, 3, 1))                      # (B, W, H, C)
    xc = xc.reshape(B, W // 2, 2, H // 2, 2, C)
    xc = jnp.transpose(xc, (0, 2, 4, 1, 3, 5))                    # (B,2,2,W/2,H/2,C)
    x_flat = xc.reshape(B, N, C).astype(bf16)

    # Weights pre-transposed to (in, out); large ones in bf16 (MXU truncates
    # to bf16 at default precision anyway), biases/gate weights in f32.
    wq_t = params["wq"].T.astype(bf16)                            # (C, C8)
    wk_t = params["wk"].T.astype(bf16)                            # (C, C8)
    wv_t = params["wv"].T.astype(bf16)                            # (C, C2)
    wo_t = params["wo"].T.astype(bf16)                            # (C2, C)
    bq = params["bq"].reshape(1, C8).astype(f32)
    bk = params["bk"].reshape(1, C8).astype(f32)
    bv = params["bv"].reshape(1, C2).astype(f32)
    bo = params["bo"].reshape(1, C).astype(f32)
    w1_t = params["w1"].T.astype(f32)                             # (C, C2)
    w2_t = params["w2"].T.astype(f32)                             # (C2, C)
    gamma = params["gamma"].reshape(1, 1).astype(f32)

    # ---------------- pass 1: pooled K/V + gate, once per image -------------
    pre_need = (2 * N * C * 2                       # x block, double-buffered
                + 4 * N * (C8 + C2) * 4             # k/v f32 intermediates
                + 2 * N4 * (C8 + C2) * 2 + 2 * C * 4
                + 2 * C * (2 * C8 + 3 * C2 + C) * 4)
    kp, vp, gate = pl.pallas_call(
        partial(_preamble_kernel, N4),
        out_shape=(
            jax.ShapeDtypeStruct((B, N4, C8), bf16),
            jax.ShapeDtypeStruct((B, N4, C2), bf16),
            jax.ShapeDtypeStruct((B, 1, C), f32),
        ),
        grid=(B,),
        in_specs=[
            pl.BlockSpec((1, N, C), lambda b: (b, 0, 0)),    # x (full image)
            pl.BlockSpec((C, C8), lambda b: (0, 0)),         # Wk^T
            pl.BlockSpec((1, C8), lambda b: (0, 0)),         # bk
            pl.BlockSpec((C, C2), lambda b: (0, 0)),         # Wv^T
            pl.BlockSpec((1, C2), lambda b: (0, 0)),         # bv
            pl.BlockSpec((C, C2), lambda b: (0, 0)),         # W1^T (fc)
            pl.BlockSpec((C2, C), lambda b: (0, 0)),         # W2^T (fc)
        ],
        out_specs=(
            pl.BlockSpec((1, N4, C8), lambda b: (b, 0, 0)),  # pooled K
            pl.BlockSpec((1, N4, C2), lambda b: (b, 0, 0)),  # pooled V
            pl.BlockSpec((1, 1, C), lambda b: (b, 0, 0)),    # channel gate
        ),
        compiler_params=pltpu.CompilerParams(
            dimension_semantics=("parallel",),
            vmem_limit_bytes=_clamp_vmem(pre_need),
        ),
    )(x_flat, wk_t, bk, wv_t, bv, w1_t, w2_t)

    # Hoisted pooled-K transpose: once per image, tiny (B * N4 * C8 bf16),
    # done in plain XLA so the attention kernel never XLU-transposes per tile.
    kpt = jnp.swapaxes(kp, 1, 2)                                  # (B, C8, N4)

    # ---------------- pass 2: attention over (B, NQ) query tiles ------------
    att_need = (2 * (tq * C * 2 + C8 * N4 * 2 + N4 * C2 * 2 + C * 4
                     + tq * C * 4)                  # double-buffered blocks
                + 4 * tq * N4 * 4                   # energy / p intermediates
                + 4 * tq * (C2 + C) * 4
                + 2 * C * (C8 + C2 + C) * 2)
    out_flat = pl.pallas_call(
        _attn_kernel,
        out_shape=jax.ShapeDtypeStruct((B, N, C), f32),
        grid=(B, NQ),
        in_specs=[
            pl.BlockSpec((1, tq, C), lambda b, q: (b, q, 0)),   # x query tile
            pl.BlockSpec((1, C8, N4), lambda b, q: (b, 0, 0)),  # pooled K^T
            pl.BlockSpec((1, N4, C2), lambda b, q: (b, 0, 0)),  # pooled V
            pl.BlockSpec((1, 1, C), lambda b, q: (b, 0, 0)),    # channel gate
            pl.BlockSpec((C, C8), lambda b, q: (0, 0)),         # Wq^T
            pl.BlockSpec((1, C8), lambda b, q: (0, 0)),         # bq
            pl.BlockSpec((C2, C), lambda b, q: (0, 0)),         # Wo^T
            pl.BlockSpec((1, C), lambda b, q: (0, 0)),          # bo
            pl.BlockSpec(memory_space=pltpu.MemorySpace.SMEM),  # gamma scalar
        ],
        out_specs=pl.BlockSpec((1, tq, C), lambda b, q: (b, q, 0)),
        compiler_params=pltpu.CompilerParams(
            dimension_semantics=("parallel", "parallel"),
            vmem_limit_bytes=_clamp_vmem(att_need),
        ),
    )(x_flat, kpt, vp, gate, wq_t, bq, wo_t, bo, gamma)

    # Invert the window-major permutation and go back to NCHW.
    oc = out_flat.reshape(B, 2, 2, W // 2, H // 2, C)
    oc = jnp.transpose(oc, (0, 3, 1, 4, 2, 5)).reshape(B, W, H, C)
    return jnp.transpose(oc, (0, 3, 1, 2))


# ---------------------------------------------------------------------------
# Pure-JAX reference (mirror of the PyTorch forward, f32 / HIGHEST precision).
# ---------------------------------------------------------------------------
def reference(x, p):
    B, C, W, H = x.shape
    N, Np = W * H, (W * H) // 4
    prec = lax.Precision.HIGHEST

    def conv1x1(t, w, b):
        return jnp.einsum('oc,bchw->bohw', w, t,
                          precision=prec) + b[None, :, None, None]

    def maxpool2(t):
        Bb, Ck, ww, hh = t.shape
        return t.reshape(Bb, Ck, ww // 2, 2, hh // 2, 2).max(axis=(3, 5))

    q = conv1x1(x, p["wq"], p["bq"]).reshape(B, -1, N).transpose(0, 2, 1)  # (B,N,C8)
    k = maxpool2(conv1x1(x, p["wk"], p["bk"])).reshape(B, -1, Np)          # (B,C8,Np)
    energy = jnp.einsum('bnc,bcp->bnp', q, k, precision=prec)
    att = jax.nn.softmax(energy, axis=-1)
    v = maxpool2(conv1x1(x, p["wv"], p["bv"])).reshape(B, -1, Np)          # (B,C2,Np)
    o = jnp.einsum('bcp,bnp->bcn', v, att,
                   precision=prec).reshape(B, C // 2, W, H)
    o = conv1x1(o, p["wo"], p["bo"])
    y = x.mean(axis=(2, 3))                                                # (B,C)
    y = jax.nn.sigmoid(
        jnp.maximum(jnp.dot(y, p["w1"].T, precision=prec), 0.0)
        @ p["w2"].T)                                                       # (B,C)
    return p["gamma"].reshape(()) * o + x * y[:, :, None, None]


if __name__ == "__main__":
    key = jax.random.PRNGKey(0)
    ks = jax.random.split(key, 12)

    B, C, W, H = 2, 16, 16, 16           # N = 256, C/8 = 2, C/2 = 8
    C8, C2 = C // 8, C // 2

    params = {
        "wq": 0.2 * jax.random.normal(ks[0], (C8, C), jnp.float32),
        "bq": 0.1 * jax.random.normal(ks[1], (C8,), jnp.float32),
        "wk": 0.2 * jax.random.normal(ks[2], (C8, C), jnp.float32),
        "bk": 0.1 * jax.random.normal(ks[3], (C8,), jnp.float32),
        "wv": 0.2 * jax.random.normal(ks[4], (C2, C), jnp.float32),
        "bv": 0.1 * jax.random.normal(ks[5], (C2,), jnp.float32),
        "wo": 0.2 * jax.random.normal(ks[6], (C, C2), jnp.float32),
        "bo": 0.1 * jax.random.normal(ks[7], (C,), jnp.float32),
        "w1": 0.2 * jax.random.normal(ks[8], (C2, C), jnp.float32),
        "w2": 0.2 * jax.random.normal(ks[9], (C, C2), jnp.float32),
        # PyTorch inits gamma to 0; use a nonzero value so the attention branch
        # actually contributes and gets verified.
        "gamma": jnp.array([0.5], jnp.float32),
    }

    x = jax.random.normal(ks[10], (B, C, W, H), jnp.float32)

    # tq=64 -> 4 query tiles per batch element: exercises the tiled path.
    out = chanelspace_attn_pallas(x, params, tq=64)
    out = jax.block_until_ready(out)

    ref = reference(x, params)
    assert out.shape == ref.shape == (B, C, W, H)
    # Tolerance accounts for bf16 activations/weights on the MXU path, the
    # bf16 residual copy of x, and the approximate EUP reciprocal, vs. the
    # f32 HIGHEST-precision reference; observed error is ~1e-2, while any
    # structural bug (wrong permutation / pooling window) would be O(0.1-1).
    err = float(jnp.max(jnp.abs(out - ref)))
    assert jnp.allclose(out, ref, rtol=2e-2, atol=5e-2), (
        "max abs err = %e" % err)

    print("KERNEL_OK")
</pallas_src>

<mosaic_0001>
module attributes {stable_mosaic.version = 11 : i64} {
  func.func @_preamble_kernel(%arg0: i32, %arg1: memref<1x256x16xbf16, #tpu.memory_space<vmem>>, %arg2: memref<16x2xbf16, #tpu.memory_space<vmem>>, %arg3: memref<1x2xf32, #tpu.memory_space<vmem>>, %arg4: memref<16x8xbf16, #tpu.memory_space<vmem>>, %arg5: memref<1x8xf32, #tpu.memory_space<vmem>>, %arg6: memref<16x8xf32, #tpu.memory_space<vmem>>, %arg7: memref<8x16xf32, #tpu.memory_space<vmem>>, %arg8: memref<1x64x2xbf16, #tpu.memory_space<vmem>>, %arg9: memref<1x64x8xbf16, #tpu.memory_space<vmem>>, %arg10: memref<1x1x16xf32, #tpu.memory_space<vmem>>) attributes {dimension_semantics = [#tpu.dimension_semantics<parallel>], iteration_bounds = array<i64: 2>, scalar_prefetch = 0 : i64, scratch_operands = 0 : i64, tpu.core_type = #tpu.core_type<tc>, window_params = [{transform_indices = @transform_0, window_bounds = array<i64: 1, 256, 16>}, {pipeline_mode = #tpu.pipeline_mode<synchronous>, transform_indices = @transform_1, window_bounds = array<i64: 16, 2>}, {pipeline_mode = #tpu.pipeline_mode<synchronous>, transform_indices = @transform_2, window_bounds = array<i64: 1, 2>}, {pipeline_mode = #tpu.pipeline_mode<synchronous>, transform_indices = @transform_3, window_bounds = array<i64: 16, 8>}, {pipeline_mode = #tpu.pipeline_mode<synchronous>, transform_indices = @transform_4, window_bounds = array<i64: 1, 8>}, {pipeline_mode = #tpu.pipeline_mode<synchronous>, transform_indices = @transform_5, window_bounds = array<i64: 16, 8>}, {pipeline_mode = #tpu.pipeline_mode<synchronous>, transform_indices = @transform_6, window_bounds = array<i64: 8, 16>}, {transform_indices = @transform_7, window_bounds = array<i64: 1, 64, 2>}, {transform_indices = @transform_8, window_bounds = array<i64: 1, 64, 8>}, {transform_indices = @transform_9, window_bounds = array<i64: 1, 1, 16>}]} {
    %c0 = arith.constant 0 : index
    %c0_0 = arith.constant 0 : index
    %c0_1 = arith.constant 0 : index
    %0 = vector.load %arg1[%c0, %c0_0, %c0_1] : memref<1x256x16xbf16, #tpu.memory_space<vmem>>, vector<1x256x16xbf16>
    %1 = vector.shape_cast %0 : vector<1x256x16xbf16> to vector<256x16xbf16>
    %c0_2 = arith.constant 0 : index
    %c0_3 = arith.constant 0 : index
    %2 = vector.load %arg2[%c0_2, %c0_3] : memref<16x2xbf16, #tpu.memory_space<vmem>>, vector<16x2xbf16>
    %cst = arith.constant dense<0.000000e+00> : vector<256x2xf32>
    %3 = tpu.matmul %1, %2, %cst {dimension_numbers = #tpu.dot_dimension_numbers<[1], [0], [0], [1], [0, 0, 1, 1], [], []>} : vector<256x16xbf16>, vector<16x2xbf16>, vector<256x2xf32> -> vector<256x2xf32>
    %c0_4 = arith.constant 0 : index
    %c0_5 = arith.constant 0 : index
    %4 = vector.load %arg3[%c0_4, %c0_5] : memref<1x2xf32, #tpu.memory_space<vmem>>, vector<1x2xf32>
    %5 = vector.broadcast %4 : vector<1x2xf32> to vector<256x2xf32>
    %6 = arith.addf %3, %5 : vector<256x2xf32>
    %c0_6 = arith.constant 0 : index
    %c0_7 = arith.constant 0 : index
    %7 = vector.load %arg4[%c0_6, %c0_7] : memref<16x8xbf16, #tpu.memory_space<vmem>>, vector<16x8xbf16>
    %cst_8 = arith.constant dense<0.000000e+00> : vector<256x8xf32>
    %8 = tpu.matmul %1, %7, %cst_8 {dimension_numbers = #tpu.dot_dimension_numbers<[1], [0], [0], [1], [0, 0, 1, 1], [], []>} : vector<256x16xbf16>, vector<16x8xbf16>, vector<256x8xf32> -> vector<256x8xf32>
    %c0_9 = arith.constant 0 : index
    %c0_10 = arith.constant 0 : index
    %9 = vector.load %arg5[%c0_9, %c0_10] : memref<1x8xf32, #tpu.memory_space<vmem>>, vector<1x8xf32>
    %10 = vector.broadcast %9 : vector<1x8xf32> to vector<256x8xf32>
    %11 = arith.addf %8, %10 : vector<256x8xf32>
    %12 = vector.extract_strided_slice %6 {offsets = [0, 0], sizes = [64, 2], strides = [1, 1]} : vector<256x2xf32> to vector<64x2xf32>
    %13 = vector.extract_strided_slice %6 {offsets = [64, 0], sizes = [64, 2], strides = [1, 1]} : vector<256x2xf32> to vector<64x2xf32>
    %14 = arith.maximumf %12, %13 : vector<64x2xf32>
    %15 = vector.extract_strided_slice %6 {offsets = [128, 0], sizes = [64, 2], strides = [1, 1]} : vector<256x2xf32> to vector<64x2xf32>
    %16 = vector.extract_strided_slice %6 {offsets = [192, 0], sizes = [64, 2], strides = [1, 1]} : vector<256x2xf32> to vector<64x2xf32>
    %17 = arith.maximumf %15, %16 : vector<64x2xf32>
    %18 = arith.maximumf %14, %17 : vector<64x2xf32>
    %19 = vector.extract_strided_slice %11 {offsets = [0, 0], sizes = [64, 8], strides = [1, 1]} : vector<256x8xf32> to vector<64x8xf32>
    %20 = vector.extract_strided_slice %11 {offsets = [64, 0], sizes = [64, 8], strides = [1, 1]} : vector<256x8xf32> to vector<64x8xf32>
    %21 = arith.maximumf %19, %20 : vector<64x8xf32>
    %22 = vector.extract_strided_slice %11 {offsets = [128, 0], sizes = [64, 8], strides = [1, 1]} : vector<256x8xf32> to vector<64x8xf32>
    %23 = vector.extract_strided_slice %11 {offsets = [192, 0], sizes = [64, 8], strides = [1, 1]} : vector<256x8xf32> to vector<64x8xf32>
    %24 = arith.maximumf %22, %23 : vector<64x8xf32>
    %25 = arith.maximumf %21, %24 : vector<64x8xf32>
    %26 = arith.truncf %18 : vector<64x2xf32> to vector<64x2xbf16>
    %c0_11 = arith.constant 0 : index
    %c0_12 = arith.constant 0 : index
    %c0_13 = arith.constant 0 : index
    %27 = vector.load %arg8[%c0_11, %c0_12, %c0_13] : memref<1x64x2xbf16, #tpu.memory_space<vmem>>, vector<1x64x2xbf16>
    %28 = vector.shape_cast %27 : vector<1x64x2xbf16> to vector<64x2xbf16>
    %29 = vector.shape_cast %26 : vector<64x2xbf16> to vector<1x64x2xbf16>
    tpu.vector_store %arg8[%c0_11, %c0_12, %c0_13], %29 {strides = array<i32>} : memref<1x64x2xbf16, #tpu.memory_space<vmem>>, vector<1x64x2xbf16>,
    %30 = arith.truncf %25 : vector<64x8xf32> to vector<64x8xbf16>
    %c0_14 = arith.constant 0 : index
    %c0_15 = arith.constant 0 : index
    %c0_16 = arith.constant 0 : index
    %31 = vector.load %arg9[%c0_14, %c0_15, %c0_16] : memref<1x64x8xbf16, #tpu.memory_space<vmem>>, vector<1x64x8xbf16>
    %32 = vector.shape_cast %31 : vector<1x64x8xbf16> to vector<64x8xbf16>
    %33 = vector.shape_cast %30 : vector<64x8xbf16> to vector<1x64x8xbf16>
    tpu.vector_store %arg9[%c0_14, %c0_15, %c0_16], %33 {strides = array<i32>} : memref<1x64x8xbf16, #tpu.memory_space<vmem>>, vector<1x64x8xbf16>,
    %34 = arith.extf %1 : vector<256x16xbf16> to vector<256x16xf32>
    %cst_17 = arith.constant dense<0.000000e+00> : vector<16xf32>
    %35 = vector.multi_reduction <add>, %34, %cst_17 [0] : vector<256x16xf32> to vector<16xf32>
    %36 = vector.shape_cast %35 : vector<16xf32> to vector<1x16xf32>
    %cst_18 = arith.constant 2.560000e+02 : f32
    %37 = vector.broadcast %cst_18 : f32 to vector<1x16xf32>
    %38 = arith.divf %36, %37 : vector<1x16xf32>
    %c0_19 = arith.constant 0 : index
    %c0_20 = arith.constant 0 : index
    %39 = vector.load %arg6[%c0_19, %c0_20] : memref<16x8xf32, #tpu.memory_space<vmem>>, vector<16x8xf32>
    %cst_21 = arith.constant dense<0.000000e+00> : vector<1x8xf32>
    %40 = tpu.matmul %38, %39, %cst_21 {dimension_numbers = #tpu.dot_dimension_numbers<[1], [0], [0], [1], [0, 0, 1, 1], [], []>} : vector<1x16xf32>, vector<16x8xf32>, vector<1x8xf32> -> vector<1x8xf32>
    %cst_22 = arith.constant 0.000000e+00 : f32
    %41 = vector.broadcast %cst_22 : f32 to vector<1x8xf32>
    %42 = arith.maximumf %40, %41 : vector<1x8xf32>
    %c0_23 = arith.constant 0 : index
    %c0_24 = arith.constant 0 : index
    %43 = vector.load %arg7[%c0_23, %c0_24] : memref<8x16xf32, #tpu.memory_space<vmem>>, vector<8x16xf32>
    %cst_25 = arith.constant dense<0.000000e+00> : vector<1x16xf32>
    %44 = tpu.matmul %42, %43, %cst_25 {dimension_numbers = #tpu.dot_dimension_numbers<[1], [0], [0], [1], [0, 0, 1, 1], [], []>} : vector<1x8xf32>, vector<8x16xf32>, vector<1x16xf32> -> vector<1x16xf32>
    %cst_26 = arith.constant 0.000000e+00 : f32
    %45 = vector.broadcast %cst_26 : f32 to vector<1x16xf32>
    %46 = arith.subf %45, %44 : vector<1x16xf32>
    %47 = math.exp %46 : vector<1x16xf32>
    %cst_27 = arith.constant 1.000000e+00 : f32
    %48 = vector.broadcast %cst_27 : f32 to vector<1x16xf32>
    %49 = arith.addf %48, %47 : vector<1x16xf32>
    %cst_28 = arith.constant 1.000000e+00 : f32
    %50 = vector.broadcast %cst_28 : f32 to vector<1x16xf32>
    %51 = arith.divf %50, %49 : vector<1x16xf32>
    %c0_29 = arith.constant 0 : index
    %c0_30 = arith.constant 0 : index
    %c0_31 = arith.constant 0 : index
    %52 = vector.load %arg10[%c0_29, %c0_30, %c0_31] : memref<1x1x16xf32, #tpu.memory_space<vmem>>, vector<1x1x16xf32>
    %53 = vector.shape_cast %52 : vector<1x1x16xf32> to vector<1x16xf32>
    %54 = vector.shape_cast %51 : vector<1x16xf32> to vector<1x1x16xf32>
    tpu.vector_store %arg10[%c0_29, %c0_30, %c0_31], %54 {strides = array<i32>} : memref<1x1x16xf32, #tpu.memory_space<vmem>>, vector<1x1x16xf32>,
    return
  }
  func.func @transform_0(%arg0: i32) -> (i32, i32, i32) {
    %c0_i32 = arith.constant 0 : i32
    %c0_i32_0 = arith.constant 0 : i32
    %c0_i32_1 = arith.constant 0 : i32
    return %arg0, %c0_i32, %c0_i32_0 : i32, i32, i32
  }
  func.func @transform_1(%arg0: i32) -> (i32, i32) {
    %c0_i32 = arith.constant 0 : i32
    %c0_i32_0 = arith.constant 0 : i32
    %c0_i32_1 = arith.constant 0 : i32
    return %c0_i32, %c0_i32_0 : i32, i32
  }
  func.func @transform_2(%arg0: i32) -> (i32, i32) {
    %c0_i32 = arith.constant 0 : i32
    %c0_i32_0 = arith.constant 0 : i32
    %c0_i32_1 = arith.constant 0 : i32
    return %c0_i32, %c0_i32_0 : i32, i32
  }
  func.func @transform_3(%arg0: i32) -> (i32, i32) {
    %c0_i32 = arith.constant 0 : i32
    %c0_i32_0 = arith.constant 0 : i32
    %c0_i32_1 = arith.constant 0 : i32
    return %c0_i32, %c0_i32_0 : i32, i32
  }
  func.func @transform_4(%arg0: i32) -> (i32, i32) {
    %c0_i32 = arith.constant 0 : i32
    %c0_i32_0 = arith.constant 0 : i32
    %c0_i32_1 = arith.constant 0 : i32
    return %c0_i32, %c0_i32_0 : i32, i32
  }
  func.func @transform_5(%arg0: i32) -> (i32, i32) {
    %c0_i32 = arith.constant 0 : i32
    %c0_i32_0 = arith.constant 0 : i32
    %c0_i32_1 = arith.constant 0 : i32
    return %c0_i32, %c0_i32_0 : i32, i32
  }
  func.func @transform_6(%arg0: i32) -> (i32, i32) {
    %c0_i32 = arith.constant 0 : i32
    %c0_i32_0 = arith.constant 0 : i32
    %c0_i32_1 = arith.constant 0 : i32
    return %c0_i32, %c0_i32_0 : i32, i32
  }
  func.func @transform_7(%arg0: i32) -> (i32, i32, i32) {
    %c0_i32 = arith.constant 0 : i32
    %c0_i32_0 = arith.constant 0 : i32
    %c0_i32_1 = arith.constant 0 : i32
    return %arg0, %c0_i32, %c0_i32_0 : i32, i32, i32
  }
  func.func @transform_8(%arg0: i32) -> (i32, i32, i32) {
    %c0_i32 = arith.constant 0 : i32
    %c0_i32_0 = arith.constant 0 : i32
    %c0_i32_1 = arith.constant 0 : i32
    return %arg0, %c0_i32, %c0_i32_0 : i32, i32, i32
  }
  func.func @transform_9(%arg0: i32) -> (i32, i32, i32) {
    %c0_i32 = arith.constant 0 : i32
    %c0_i32_0 = arith.constant 0 : i32
    %c0_i32_1 = arith.constant 0 : i32
    return %arg0, %c0_i32, %c0_i32_0 : i32, i32, i32
  }
}

</mosaic_0001>

<bundles_post_ra>
// kernel: tpu_custom_call.1
= control target key start
LH: loop header
LB: loop body
LE: loop exit
PB: predicated region body
PF: predicated region fallthrough
CT: control target
= control target key end

     0   :  { %15 = vsyncpa [#allocation3], 0  ;;  %s2306_s0 = inlined_call_operand.vmem [shape: bf16[2,256,16], index: 0, kind: input, shape index: {}]   ;;  %s2307_s1 = inlined_call_operand.vmem [shape: bf16[16,2], index: 1, kind: input, shape index: {}]   ;;  %s2308_s2 = inlined_call_operand.vmem [shape: f32[1,2], index: 2, kind: input, shape index: {}]   ;;  %s2309_s3 = inlined_call_operand.vmem [shape: bf16[16,8], index: 3, kind: input, shape index: {}]   ;;  %s2310_s4 = inlined_call_operand.vmem [shape: f32[1,8], index: 4, kind: input, shape index: {}]   ;;  %s2311_s5 = inlined_call_operand.vmem [shape: f32[16,8], index: 5, kind: input, shape index: {}]   ;;  %s2312_s6 = inlined_call_operand.vmem [shape: f32[8,16], index: 6, kind: input, shape index: {}]   ;;  %s2313_s7 = inlined_call_operand.vmem [shape: bf16[2,64,2], index: 7, kind: output, shape index: {0}]   ;;  %s2314_s8 = inlined_call_operand.vmem [shape: bf16[2,64,8], index: 8, kind: output, shape index: {1}]   ;;  %s2315_s9 = inlined_call_operand.hbm [shape: f32[2,1,16], index: 9, kind: output, shape index: {2}]  }
   0x1   :  { %17 = vsyncpa [#allocation3 + $0x1], 0  ;;  %s1817_s30 = smov 0   ;;  %s1819_s10 = smov 0  }
   0x2   :  { %s1821_s11 = smov 0   ;;  %s1823_s12 = smov 0  }
   0x3 LB: > { %s1838_s13 = sadd.s32 4294967295, %s1761_s12   ;;  %s1395_s14 = sadd.s32 4294967294, %s1761_s12   ;;  %s1761_s12 = sphi %s1823_s12, %s2352_s12   ;;  %s1757_s11 = sphi %s1821_s11, %s2351_s11   ;;  %s1753_s10 = sphi %s1819_s10, %s2350_s10   ;;  %s1749_s30 = sphi %s1817_s30, %s2349_s30  }
   0x4   : > { %s1842_s15 = sadd.s32 1, %s1761_s12   ;;  %s234_s16 = sadd.s32 1, %s1757_s11 }
   0x5   : > { %s231_s17 = ssub.s32 %s1761_s12, %s1842_s15  ;;  %p244_p0 = scmp.ne.s32.totalorder %s1757_s11, %s1753_s10 }
   0x6   : > { %p232_p1 = scmp.eq.s32.totalorder %s231_s17, 0  ;;  %p245_p2 = scmp.eq.s32.totalorder %s1838_s13, 1 }
   0x7   : > { %p250_p3 = scmp.ne.s32.totalorder %s1753_s10, %s1749_s30  ;;  %p251_p4 = scmp.eq.s32.totalorder %s1395_s14, 1 }
   0x8   : > { %s1853_s18 = scalar_select %p232_p1, %s1757_s11, %s234_s16  }
   0x9   : > { %p1855_p5 = por %p245_p2, %p244_p0  ;;  %p1859_p6 = por %p251_p4, %p250_p3 }
   0xa   : > { %p1398_p7 = scmp.ge.s32.totalorder %s1761_s12, 1  ;;  %p295_p8 = scmp.lt.s32.totalorder %s1761_s12, 3 }
   0xc   : > { %p296_p9 = pnand %p1398_p7, %p295_p8 }
   0xe   : > { %299 = sbr.rel (%p296_p9) target bundleno = 575 (0x23f), region = 48 }
  0x15   : > { %v1661_v0 = vld [vmem:[%s2307_s1] sm:$0xff]   ;;  %p340_p10 = scmp.lt.s32.totalorder %s1838_s13, 1  ;;  %v1103_v3 = vld [vmem:[%s2311_s5 + $0x8] sm:$0xff]  ;;  %v1763_v4 = vmov 0.0|0.0   ;;  %vm483_vm0 = vcmask 130048   ;;  %v1764_v9 = vmov 0.0  }
  0x16   : > { %1536 = vmatprep.subr.bf16.mxu0 %v1661_v0  ;;  %v1678_v1 = vld [vmem:[%s2309_s3] sm:$0xff]   ;;  %vm1765_vm1 = vmmov 0   ;;  %vm949_vm2 = vcmask 11264   ;;  %vm990_vm3 = vcmask 60416   ;;  %vm1179_vm4 = vcmask 64512   ;;  %s338_s24 = sand.u32 1, %s1753_s10  }
  0x17   : > { %s1870_s23 = scalar_select %p340_p10, %s1838_s13, 1  ;;  %1537 = vmatpush3.bf16.msra.mxu0 %v1661_v0  ;;  %v1102_v2 = vld [vmem:[%s2311_s5] sm:$0xff]  ;;  %1570 = vmatprep.subr.bf16.mxu1 %v1678_v1  ;;  %vm1259_vm5 = vcmask 122880  }
  0x18   : > { %1616 = vmatprep.subr.bf16.mxu0 %v1763_v4  ;;  %1571 = vmatpush3.bf16.msra.mxu1 %v1678_v1  ;;  %v1617_v8 = vpack.c.bf16 %v1103_v3, %v1102_v2  ;;  %s1475_s25 = sshll.u32 %s1838_s13, 4  ;;  %s339_s26 = scalar_lea.vmem [#allocation2], %s338_s24 }
  0x19   : > { %s1478_s14 = sshll.u32 %s1870_s23, 7  ;;  %1611 = vmatprep.subr.mxu1 %v1764_v9  ;;  %s1479_s29 = sshll.u32 %s1870_s23, 5 }
  0x1a   : > { %s1885_s21 = scalar_lea.vmem %s2306_s0, %s1478_s14  ;;  %s2162_s16 = scalar_lea.vmem %s2313_s7, %s1479_s29 }
  0x1b   : > { %v356_v5 = vld [vmem:[%s1885_s21] sm:$0xff]   ;;  %v358_v6 = vld [vmem:[%s1885_s21 + $0x8] sm:$0xff]   ;;  %v360_v7 = vld [vmem:[%s1885_s21 + $0x10] sm:$0xff]   ;;  %s2170_s22 = scalar_lea.vmem %s2314_s8, %s1479_s29  ;;  %s1290_s27 = sshll.u32 %s339_s26, 4  ;;  %s2266_s27 = int_to_ptr.vmem [resolvable:$true] %s1290_s27 }
  0x1c   : > { %v999_v10 = vunpack.c.l.bf16 %v356_v5  ;;  %v1000_v11 = vunpack.c.h.bf16 %v356_v5  ;;  %v1001_v12 = vunpack.c.l.bf16 %v358_v6  ;;  %v1002_v13 = vunpack.c.h.bf16 %v358_v6  ;;  %1538 = vmatprep.mubr.msk.bf16.mxu0 %vm483_vm0, %v356_v5  ;;  %1572 = vmatprep.mubr.msk.bf16.mxu1 %vm483_vm0, %v356_v5  ;;  %v362_v19 = vld [vmem:[%s1885_s21 + $0x18] sm:$0xff]   ;;  %v364_v26 = vld [vmem:[%s1885_s21 + $0x20] sm:$0xff]   ;;  %v366_v33 = vld [vmem:[%s1885_s21 + $0x28] sm:$0xff]   ;;  %s2264_s23 = scalar_lea.hbm %s2315_s9, %s1475_s25  ;;  %s1272_s14 = scalar_lea.sflag [#allocation3], %s338_s24 }
  0x1d   : > { %v1003_v17 = vunpack.c.l.bf16 %v360_v7  ;;  %1539 = vmatmul.mubr.msk.bf16.vlgmr.msra.gmra.mrb[0].mxu0 %vm483_vm0, %v358_v6  ;;  %1573 = vmatmul.mubr.msk.bf16.vlgmr.msra.gmra.mrb[0].mxu1 %vm483_vm0, %v358_v6  ;;  %v1004_v21 = vunpack.c.h.bf16 %v360_v7  ;;  %v1005_v24 = vunpack.c.l.bf16 %v362_v19  ;;  %v1006_v28 = vunpack.c.h.bf16 %v362_v19  ;;  %v368_v40 = vld [vmem:[%s1885_s21 + $0x30] sm:$0xff]   ;;  %v370_v47 = vld [vmem:[%s1885_s21 + $0x38] sm:$0xff]   ;;  %v372_v54 = vld [vmem:[%s1885_s21 + $0x40] sm:$0xff]   ;;  %s1766_s13 = smov [#allocation2]  }
  0x1e   : > { %v1031_v14 = vsel %vm483_vm0, %v999_v10, 0.0  ;;  %v1032_v15 = vsel %vm483_vm0, %v1000_v11, 0.0  ;;  %v1034_v16 = vsel %vm483_vm0, %v1001_v12, 0.0  ;;  %v1036_v20 = vsel %vm483_vm0, %v1002_v13, 0.0  ;;  %1542 = vmatprep.mubr.msk.bf16.mxu0 %vm483_vm0, %v360_v7  ;;  %1618 = vmatpush3.bf16.msra.mxu0 %v1617_v8  ;;  %v374_v61 = vld [vmem:[%s1885_s21 + $0x48] sm:$0xff]   ;;  %v376_v4 = vld [vmem:[%s1885_s21 + $0x50] sm:$0xff]  }
  0x1f   : > { %v1033_v18 = vadd.f32 %v1032_v15, %v1031_v14  ;;  %1576 = vmatprep.mubr.msk.bf16.mxu1 %vm483_vm0, %v360_v7  ;;  %v1038_v23 = vsel %vm483_vm0, %v1003_v17, 0.0  ;;  %v1040_v27 = vsel %vm483_vm0, %v1004_v21, 0.0  ;;  %v1042_v30 = vsel %vm483_vm0, %v1005_v24, 0.0  ;;  %v378_v12 = vld [vmem:[%s1885_s21 + $0x58] sm:$0xff]   ;;  %s1703_s17 = sshll.u32 %s1766_s13, 4  ;;  %s1704_s17 = int_to_ptr.vmem [resolvable:$false] %s1703_s17 }
  0x20   : > { %v1007_v31 = vunpack.c.l.bf16 %v364_v26  ;;  %v1044_v34 = vsel %vm483_vm0, %v1006_v28, 0.0  ;;  %v1008_v35 = vunpack.c.h.bf16 %v364_v26  ;;  %v1009_v38 = vunpack.c.l.bf16 %v366_v33  ;;  %p1706_p0 = scmp.lt.s32.totalorder %s2266_s27, %s1704_s17 }
  0x21   : > { %v1035_v22 = vadd.f32 %v1034_v16, %v1033_v18  ;;  %v1010_v42 = vunpack.c.h.bf16 %v366_v33  ;;  %v1011_v45 = vunpack.c.l.bf16 %v368_v40  ;;  %v1012_v49 = vunpack.c.h.bf16 %v368_v40 }
  0x22   : > { %v1046_v37 = vsel %vm483_vm0, %v1007_v31, 0.0  ;;  %v1048_v41 = vsel %vm483_vm0, %v1008_v35, 0.0  ;;  %v1050_v44 = vsel %vm483_vm0, %v1009_v38, 0.0  ;;  %v1013_v52 = vunpack.c.l.bf16 %v370_v47 }
  0x23   : > { %v1037_v25 = vadd.f32 %v1036_v20, %v1035_v22  ;;  %v1052_v48 = vsel %vm483_vm0, %v1010_v42, 0.0  ;;  %v1054_v51 = vsel %vm483_vm0, %v1011_v45, 0.0  ;;  %v1056_v55 = vsel %vm483_vm0, %v1012_v49, 0.0 }
  0x24   : > { %v1014_v56 = vunpack.c.h.bf16 %v370_v47  ;;  %v1058_v58 = vsel %vm483_vm0, %v1013_v52, 0.0  ;;  %v1015_v59 = vunpack.c.l.bf16 %v372_v54  ;;  %v1016_v63 = vunpack.c.h.bf16 %v372_v54 }
  0x25   : > { %v1039_v29 = vadd.f32 %v1038_v23, %v1037_v25  ;;  %1543 = vmatmul.mubr.msk.bf16.gmra.mrb[4].mxu0 %vm483_vm0, %v362_v19  ;;  %1577 = vmatmul.mubr.msk.bf16.gmra.mrb[4].mxu1 %vm483_vm0, %v362_v19  ;;  %v1017_v2 = vunpack.c.l.bf16 %v374_v61  ;;  %v1018_v6 = vunpack.c.h.bf16 %v374_v61  ;;  %v1019_v10 = vunpack.c.l.bf16 %v376_v4  ;;  %v380_v19 = vld [vmem:[%s1885_s21 + $0x60] sm:$0xff]  }
  0x26   : > { %1546 = vmatprep.mubr.msk.bf16.mxu0 %vm483_vm0, %v364_v26  ;;  %1580 = vmatprep.mubr.msk.bf16.mxu1 %vm483_vm0, %v364_v26  ;;  %v1060_v62 = vsel %vm483_vm0, %v1014_v56, 0.0  ;;  %v1062_v1 = vsel %vm483_vm0, %v1015_v59, 0.0  ;;  %v1064_v5 = vsel %vm483_vm0, %v1016_v63, 0.0  ;;  %v1020_v14 = vunpack.c.h.bf16 %v376_v4  ;;  %v382_v26 = vld [vmem:[%s1885_s21 + $0x68] sm:$0xff]  }
  0x27   : > { %v1041_v32 = vadd.f32 %v1040_v27, %v1039_v29  ;;  %v1066_v8 = vsel %vm483_vm0, %v1017_v2, 0.0  ;;  %v1068_v13 = vsel %vm483_vm0, %v1018_v6, 0.0  ;;  %v1070_v16 = vsel %vm483_vm0, %v1019_v10, 0.0 }
  0x28   : > { %v1021_v17 = vunpack.c.l.bf16 %v378_v12  ;;  %v1072_v20 = vsel %vm483_vm0, %v1020_v14, 0.0  ;;  %v1022_v21 = vunpack.c.h.bf16 %v378_v12  ;;  %v1023_v24 = vunpack.c.l.bf16 %v380_v19 }
  0x29   : > { %v1043_v36 = vadd.f32 %v1042_v30, %v1041_v32  ;;  %v1024_v28 = vunpack.c.h.bf16 %v380_v19  ;;  %v1025_v31 = vunpack.c.l.bf16 %v382_v26  ;;  %v1026_v35 = vunpack.c.h.bf16 %v382_v26 }
  0x2a   : > { %v1074_v23 = vsel %vm483_vm0, %v1021_v17, 0.0  ;;  %v1076_v27 = vsel %vm483_vm0, %v1022_v21, 0.0  ;;  %v1078_v30 = vsel %vm483_vm0, %v1023_v24, 0.0 }
  0x2b   : > { %v1045_v39 = vadd.f32 %v1044_v34, %v1043_v36  ;;  %v1080_v34 = vsel %vm483_vm0, %v1024_v28, 0.0 }
  0x2d   : > { %v1047_v43 = vadd.f32 %v1046_v37, %v1045_v39  ;;  %1547 = vmatmul.mubr.msk.bf16.gmra.mrb[8].mxu0 %vm483_vm0, %v366_v33  ;;  %1581 = vmatmul.mubr.msk.bf16.gmra.mrb[8].mxu1 %vm483_vm0, %v366_v33  ;;  %v384_v33 = vld [vmem:[%s1885_s21 + $0x70] sm:$0xff]   ;;  %v1082_v37 = vsel %vm483_vm0, %v1025_v31, 0.0 }
  0x2e   : > { %1550 = vmatprep.mubr.msk.bf16.mxu0 %vm483_vm0, %v368_v40  ;;  %1584 = vmatprep.mubr.msk.bf16.mxu1 %vm483_vm0, %v368_v40  ;;  %v1027_v38 = vunpack.c.l.bf16 %v384_v33  ;;  %v386_v40 = vld [vmem:[%s1885_s21 + $0x78] sm:$0xff]   ;;  %v1028_v42 = vunpack.c.h.bf16 %v384_v33  ;;  %s1705_s21 = scalar_lea.vmem %s1704_s17, 32 }
  0x2f   : > { %v1049_v46 = vadd.f32 %v1048_v41, %v1047_v43  ;;  %v1084_v41 = vsel %vm483_vm0, %v1026_v35, 0.0  ;;  %v1029_v45 = vunpack.c.l.bf16 %v386_v40 }
  0x31   : > { %v1051_v50 = vadd.f32 %v1050_v44, %v1049_v46  ;;  %v1086_v44 = vsel %vm483_vm0, %v1027_v38, 0.0 }
  0x33   : > { %v1053_v53 = vadd.f32 %v1052_v48, %v1051_v50  ;;  %v1030_v48 = vunpack.c.h.bf16 %v386_v40  ;;  %v1090_v50 = vsel %vm483_vm0, %v1029_v45, 0.0 }
  0x35   : > { %v1055_v57 = vadd.f32 %v1054_v51, %v1053_v53  ;;  %1551 = vmatmul.mubr.msk.bf16.gmra.mrb[12].mxu0 %vm483_vm0, %v370_v47  ;;  %1585 = vmatmul.mubr.msk.bf16.gmra.mrb[12].mxu1 %vm483_vm0, %v370_v47  ;;  %v1088_v47 = vsel %vm483_vm0, %v1028_v42, 0.0  ;;  %v1092_v52 = vsel %vm483_vm0, %v1030_v48, 0.0 }
  0x36   : > { %1554 = vmatprep.mubr.msk.bf16.mxu0 %vm483_vm0, %v372_v54  ;;  %1588 = vmatprep.mubr.msk.bf16.mxu1 %vm483_vm0, %v372_v54 }
  0x37   : > { %v1057_v60 = vadd.f32 %v1056_v55, %v1055_v57 }
  0x39   : > { %v1059_v0 = vadd.f32 %v1058_v58, %v1057_v60 }
  0x3b   : > { %v1061_v3 = vadd.f32 %v1060_v62, %v1059_v0  ;;  %v1178_v62 = vld [vmem:[%s2312_s6] sm:$0xff] }
  0x3c   : > { %1612 = vmatpush3.msra.mxu1 %v1178_v62 }
  0x3d   : > { %v1063_v7 = vadd.f32 %v1062_v1, %v1061_v3  ;;  %1555 = vmatmul.mubr.msk.bf16.gmra.mrb[16].mxu0 %vm483_vm0, %v374_v61  ;;  %1589 = vmatmul.mubr.msk.bf16.gmra.mrb[16].mxu1 %vm483_vm0, %v374_v61 }
  0x3e   : > { %1558 = vmatprep.mubr.msk.bf16.mxu0 %vm483_vm0, %v376_v4  ;;  %1592 = vmatprep.mubr.msk.bf16.mxu1 %vm483_vm0, %v376_v4 }
  0x3f   : > { %v1065_v11 = vadd.f32 %v1064_v5, %v1063_v7 }
  0x41   : > { %v1067_v15 = vadd.f32 %v1066_v8, %v1065_v11 }
  0x43   : > { %v1069_v18 = vadd.f32 %v1068_v13, %v1067_v15  ;;  %v1977_v15 = vld [vmem:[%s2310_s4] ss:$0 sm:$0xff] }
  0x45   : > { %v1071_v22 = vadd.f32 %v1070_v16, %v1069_v18  ;;  %1559 = vmatmul.mubr.msk.bf16.gmra.mrb[20].mxu0 %vm483_vm0, %v378_v12  ;;  %1593 = vmatmul.mubr.msk.bf16.gmra.mrb[20].mxu1 %vm483_vm0, %v378_v12  ;;  %v1982_v16 = vld [vmem:[%s2308_s2] ss:$0 sm:$0xff] }
  0x46   : > { %1562 = vmatprep.mubr.msk.bf16.mxu0 %vm483_vm0, %v380_v19  ;;  %1596 = vmatprep.mubr.msk.bf16.mxu1 %vm483_vm0, %v380_v19 }
  0x47   : > { %v1073_v25 = vadd.f32 %v1072_v20, %v1071_v22 }
  0x49   : > { %v1075_v29 = vadd.f32 %v1074_v23, %v1073_v25 }
  0x4b   : > { %v1077_v32 = vadd.f32 %v1076_v27, %v1075_v29 }
  0x4d   : > { %v1079_v36 = vadd.f32 %v1078_v30, %v1077_v32  ;;  %1563 = vmatmul.mubr.msk.bf16.gmra.mrb[24].mxu0 %vm483_vm0, %v382_v26  ;;  %1597 = vmatmul.mubr.msk.bf16.gmra.mrb[24].mxu1 %vm483_vm0, %v382_v26 }
  0x4e   : > { %1566 = vmatprep.mubr.msk.bf16.mxu0 %vm483_vm0, %v384_v33  ;;  %1600 = vmatprep.mubr.msk.bf16.mxu1 %vm483_vm0, %v384_v33 }
  0x4f   : > { %v1081_v39 = vadd.f32 %v1080_v34, %v1079_v36 }
  0x51   : > { %v1083_v43 = vadd.f32 %v1082_v37, %v1081_v39 }
  0x53   : > { %v1085_v46 = vadd.f32 %v1084_v41, %v1083_v43 }
  0x55   : > { %v1087_v49 = vadd.f32 %v1086_v44, %v1085_v46  ;;  %1567 = vmatmul.mubr.msk.bf16.gmra.mrb[28].mxu0 %vm483_vm0, %v386_v40  ;;  %1601 = vmatmul.mubr.msk.bf16.gmra.mrb[28].mxu1 %vm483_vm0, %v386_v40 }
  0x56   : > { %1608 = vmatprep.mubr.msk.f32.mxu0 %vm1765_vm1, %v1764_v9  ;;  %1613 = vmatprep.mubr.msk.f32.mxu1 %vm1765_vm1, %v1764_v9 }
  0x57   : > { %v1089_v51 = vadd.f32 %v1088_v47, %v1087_v49 }
  0x59   : > { %v1091_v53 = vadd.f32 %v1090_v50, %v1089_v51 }
  0x5b   : > { %v1093_v54 = vadd.f32 %v1092_v52, %v1091_v53 }
  0x5d   : > { %v1094_v55 = vrot.slane %v1093_v54, 4 }
  0x5f   : > { %v1095_v56 = vadd.f32 %v1094_v55, %v1093_v54 }
  0x61   : > { %v1096_v57 = vrot.slane %v1095_v56, 2 }
  0x63   : > { %v1097_v58 = vadd.f32 %v1096_v57, %v1095_v56 }
  0x65   : > { %v1098_v59 = vrot.slane %v1097_v58, 1 }
  0x67   : > { %v1099_v60 = vadd.f32 %v1098_v59, %v1097_v58 }
  0x69   : > { %v1101_v61 = vmul.f32 0.00390625, %v1099_v60 }
  0x6b   : > { %1609 = vmatmul.mubr.msk.f32.vlgmr.msra.gmra.mrb[32].mxu0 %vm483_vm0, %v1101_v61 }
  0xf0   : > { %v1540_v63 = vpop.f32.mrb[0].mxu0  ;;  %v1574_v0 = vpop.f32.mrb[0].mxu1 }
  0xf1   : > { %v566_v1 = vpop.f32.mrb[1].mxu0  ;;  %v742_v9 = vpop.f32.mrb[1].mxu1  ;;  %v1985_v17 = vadd.f32 %v1574_v0, %v1977_v15  ;;  %v1988_v18 = vadd.f32 %v1540_v63, %v1982_v16 }
  0xf2   : > { %v1541_v2 = vpop.f32.mrb[2].mxu0  ;;  %v1575_v3 = vpop.f32.mrb[2].mxu1  ;;  %v1991_v19 = vadd.f32 %v1982_v16, %v566_v1  ;;  %v1994_v21 = vadd.f32 %v1977_v15, %v742_v9 }
  0xf3   : > { %v569_v4 = vpop.f32.mrb[3].mxu0  ;;  %v745_v5 = vpop.f32.mrb[3].mxu1  ;;  %v1997_v23 = vadd.f32 %v1541_v2, %v1982_v16  ;;  %v2003_v26 = vadd.f32 %v1575_v3, %v1977_v15 }
  0xf4   : > { %v2009_v29 = vadd.f32 %v1982_v16, %v569_v4  ;;  %v2015_v32 = vadd.f32 %v1977_v15, %v745_v5 }
  0xf8   : > { %v1544_v6 = vpop.f32.mrb[4].mxu0  ;;  %v1578_v7 = vpop.f32.mrb[4].mxu1 }
  0xf9   : > { %v582_v8 = vpop.f32.mrb[5].mxu0  ;;  %v758_v10 = vpop.f32.mrb[5].mxu1  ;;  %v2049_v49 = vadd.f32 %v1578_v7, %v1977_v15  ;;  %v2052_v50 = vadd.f32 %v1544_v6, %v1982_v16 }
  0xfa   : > { %v1545_v11 = vpop.f32.mrb[6].mxu0  ;;  %v1579_v12 = vpop.f32.mrb[6].mxu1  ;;  %v2055_v51 = vadd.f32 %v1982_v16, %v582_v8  ;;  %v2058_v53 = vadd.f32 %v1977_v15, %v758_v10 }
  0xfb   : > { %v585_v13 = vpop.f32.mrb[7].mxu0  ;;  %v761_v14 = vpop.f32.mrb[7].mxu1  ;;  %v2061_v55 = vadd.f32 %v1545_v11, %v1982_v16  ;;  %v2067_v58 = vadd.f32 %v1579_v12, %v1977_v15 }
  0xfc   : > { %v2073_v61 = vadd.f32 %v1982_v16, %v585_v13  ;;  %v2079_v0 = vadd.f32 %v1977_v15, %v761_v14 }
  0xfe   : > { %2323 = vst [vmem:[#allocation5_spill] sm:$0xff] %v2073_v61  ;;  %2324 = vst [vmem:[#allocation6_spill] sm:$0xff] %v2079_v0 }
 0x100   : > { %v1548_v20 = vpop.f32.mrb[8].mxu0  ;;  %v1582_v22 = vpop.f32.mrb[8].mxu1 }
 0x101   : > { %v2000_v24 = vadd.f32 %v1548_v20, %v1982_v16  ;;  %v598_v25 = vpop.f32.mrb[9].mxu0  ;;  %v2006_v27 = vadd.f32 %v1582_v22, %v1977_v15  ;;  %v774_v28 = vpop.f32.mrb[9].mxu1 }
 0x102   : > { %v2012_v30 = vadd.f32 %v1982_v16, %v598_v25  ;;  %v1549_v31 = vpop.f32.mrb[10].mxu0  ;;  %v2018_v33 = vadd.f32 %v1977_v15, %v774_v28  ;;  %v1583_v34 = vpop.f32.mrb[10].mxu1 }
 0x103   : > { %v2023_v36 = vadd.f32 %v1549_v31, %v1982_v16  ;;  %v601_v37 = vpop.f32.mrb[11].mxu0  ;;  %v2028_v39 = vadd.f32 %v1583_v34, %v1977_v15  ;;  %v777_v40 = vpop.f32.mrb[11].mxu1 }
 0x104   : > { %v2033_v42 = vadd.f32 %v1982_v16, %v601_v37  ;;  %v2038_v44 = vadd.f32 %v1977_v15, %v777_v40 }
 0x108   : > { %v1552_v52 = vpop.f32.mrb[12].mxu0  ;;  %v1586_v54 = vpop.f32.mrb[12].mxu1 }
 0x109   : > { %v2064_v56 = vadd.f32 %v1552_v52, %v1982_v16  ;;  %v614_v57 = vpop.f32.mrb[13].mxu0  ;;  %v2070_v59 = vadd.f32 %v1586_v54, %v1977_v15  ;;  %v790_v60 = vpop.f32.mrb[13].mxu1 }
 0x10a   : > { %v2076_v62 = vadd.f32 %v1982_v16, %v614_v57  ;;  %v1553_v63 = vpop.f32.mrb[14].mxu0  ;;  %v2082_v1 = vadd.f32 %v1977_v15, %v790_v60  ;;  %v1587_v9 = vpop.f32.mrb[14].mxu1 }
 0x10b   : > { %v2087_v3 = vadd.f32 %v1553_v63, %v1982_v16  ;;  %v617_v4 = vpop.f32.mrb[15].mxu0  ;;  %v2092_v6 = vadd.f32 %v1587_v9, %v1977_v15  ;;  %v793_v7 = vpop.f32.mrb[15].mxu1 }
 0x10c   : > { %v2097_v10 = vadd.f32 %v1982_v16, %v617_v4  ;;  %v2102_v12 = vadd.f32 %v1977_v15, %v793_v7 }
 0x10d   : > { %2325 = vst [vmem:[#allocation7_spill] sm:$0xff] %v2092_v6 }
 0x10e   : > { %2326 = vst [vmem:[#allocation8_spill] sm:$0xff] %v2097_v10  ;;  %2327 = vst [vmem:[#allocation9_spill] sm:$0xff] %v2102_v12 }
 0x110   : > { %v1556_v25 = vpop.f32.mrb[16].mxu0  ;;  %v1590_v28 = vpop.f32.mrb[16].mxu1 }
 0x111   : > { %v630_v31 = vpop.f32.mrb[17].mxu0  ;;  %v806_v34 = vpop.f32.mrb[17].mxu1  ;;  %v639_v20 = vadd.f32 %v1556_v25, %v1982_v16  ;;  %v815_v11 = vadd.f32 %v1590_v28, %v1977_v15 }
 0x112   : > { %v1557_v37 = vpop.f32.mrb[18].mxu0  ;;  %v1591_v40 = vpop.f32.mrb[18].mxu1  ;;  %v631_v22 = vadd.f32 %v1982_v16, %v630_v31  ;;  %v807_v8 = vadd.f32 %v1977_v15, %v806_v34 }
 0x113   : > { %v633_v52 = vpop.f32.mrb[19].mxu0  ;;  %v809_v54 = vpop.f32.mrb[19].mxu1  ;;  %v642_v5 = vadd.f32 %v1557_v37, %v1982_v16  ;;  %v818_v48 = vadd.f32 %v1591_v40, %v1977_v15 }
 0x114   : > { %v634_v2 = vadd.f32 %v1982_v16, %v633_v52  ;;  %v810_v47 = vadd.f32 %v1977_v15, %v809_v54 }
 0x118   : > { %v1560_v57 = vpop.f32.mrb[20].mxu0  ;;  %v1594_v60 = vpop.f32.mrb[20].mxu1 }
 0x119   : > { %v646_v63 = vpop.f32.mrb[21].mxu0  ;;  %v822_v9 = vpop.f32.mrb[21].mxu1  ;;  %v2121_v46 = vadd.f32 %v1560_v57, %v1982_v16  ;;  %v2127_v28 = vadd.f32 %v1594_v60, %v1977_v15 }
 0x11a   : > { %v1561_v4 = vpop.f32.mrb[22].mxu0  ;;  %v1595_v7 = vpop.f32.mrb[22].mxu1  ;;  %v2124_v25 = vadd.f32 %v1982_v16, %v646_v63  ;;  %v2130_v34 = vadd.f32 %v1977_v15, %v822_v9 }
 0x11b   : > { %v649_v14 = vpop.f32.mrb[23].mxu0  ;;  %v825_v13 = vpop.f32.mrb[23].mxu1  ;;  %v2133_v52 = vadd.f32 %v1561_v4, %v1982_v16  ;;  %v2137_v57 = vadd.f32 %v1595_v7, %v1977_v15 }
 0x11c   : > { %v2141_v43 = vadd.f32 %v1982_v16, %v649_v14  ;;  %v2145_v41 = vadd.f32 %v1977_v15, %v825_v13  ;;  %v2328_v13 = vmax.f32 %v1988_v18, %v2000_v24 }
 0x120   : > { %v1564_v31 = vpop.f32.mrb[24].mxu0  ;;  %v1598_v37 = vpop.f32.mrb[24].mxu1 }
 0x121   : > { %v671_v40 = vadd.f32 %v1564_v31, %v1982_v16  ;;  %v662_v54 = vpop.f32.mrb[25].mxu0  ;;  %v847_v63 = vadd.f32 %v1598_v37, %v1977_v15  ;;  %v838_v45 = vpop.f32.mrb[25].mxu1 }
 0x122   : > { %v663_v60 = vadd.f32 %v1982_v16, %v662_v54  ;;  %v1565_v9 = vpop.f32.mrb[26].mxu0  ;;  %v839_v4 = vadd.f32 %v1977_v15, %v838_v45  ;;  %v1599_v38 = vpop.f32.mrb[26].mxu1 }
 0x123   : > { %v879_v31 = vmax.f32 %v639_v20, %v671_v40  ;;  %v674_v7 = vadd.f32 %v1565_v9, %v1982_v16  ;;  %v665_v35 = vpop.f32.mrb[27].mxu0  ;;  %v903_v12 = vmax.f32 %v815_v11, %v847_v63  ;;  %v850_v37 = vadd.f32 %v1599_v38, %v1977_v15  ;;  %v841_v0 = vpop.f32.mrb[27].mxu1 }
 0x124   : > { %v877_v14 = vmax.f32 %v631_v22, %v663_v60  ;;  %v666_v10 = vadd.f32 %v1982_v16, %v665_v35  ;;  %v901_v54 = vmax.f32 %v807_v8, %v839_v4  ;;  %v842_v61 = vadd.f32 %v1977_v15, %v841_v0 }
 0x125   : > { %v887_v45 = vmax.f32 %v2328_v13, %v879_v31  ;;  %v880_v6 = vmax.f32 %v642_v5, %v674_v7  ;;  %v2329_v20 = vmax.f32 %v1985_v17, %v2006_v27  ;;  %v904_v9 = vmax.f32 %v818_v48, %v850_v37 }
 0x126   : > { %v2330_v35 = vmax.f32 %v1991_v19, %v2012_v30  ;;  %v878_v0 = vmax.f32 %v634_v2, %v666_v10  ;;  %v2331_v17 = vmax.f32 %v1994_v21, %v2018_v33  ;;  %v902_v24 = vmax.f32 %v810_v47, %v842_v61 }
 0x127   : > { %v911_v40 = vmax.f32 %v2329_v20, %v903_v12  ;;  %v1483_v27 = vpack.c.bf16 %v887_v45, %v887_v45  ;;  %v2332_v48 = vmax.f32 %v1997_v23, %v2023_v36  ;;  %v2333_v30 = vmax.f32 %v2003_v26, %v2028_v39 }
 0x128   : > { %v885_v38 = vmax.f32 %v2330_v35, %v877_v14  ;;  %v909_v18 = vmax.f32 %v2331_v17, %v901_v54  ;;  %v2334_v10 = vmax.f32 %v2009_v29, %v2033_v42  ;;  %v1568_v21 = vpop.f32.mrb[28].mxu0  ;;  %v2335_v47 = vmax.f32 %v2015_v32, %v2038_v44  ;;  %v1602_v23 = vpop.f32.mrb[28].mxu1 }
 0x129   : > { %v888_v5 = vmax.f32 %v2332_v48, %v880_v6  ;;  %v1491_v19 = vpack.c.bf16 %v911_v40, %v911_v40  ;;  %v912_v2 = vmax.f32 %v2333_v30, %v904_v9  ;;  %952 = vst.msk [vmem:[%s2162_s16 + $0x8] sm:$0xf] %vm949_vm2, %v1483_v27  ;;  %v687_v26 = vadd.f32 %v1568_v21, %v1982_v16  ;;  %v678_v39 = vpop.f32.mrb[29].mxu0  ;;  %v854_v6 = vpop.f32.mrb[29].mxu1  ;;  %v2346_v27 = vld [vmem:[#allocation6_spill] sm:$0xff]  ;;  %v2347_v48 = vld [vmem:[#allocation9_spill] sm:$0xff] }
 0x12a   : > { %v1481_v8 = vpack.c.bf16 %v885_v38, %v885_v38  ;;  %v886_v11 = vmax.f32 %v2334_v10, %v878_v0  ;;  %v1489_v33 = vpack.c.bf16 %v909_v18, %v909_v18  ;;  %v910_v61 = vmax.f32 %v2335_v47, %v902_v24  ;;  %v1569_v12 = vpop.f32.mrb[30].mxu0  ;;  %v1603_v60 = vpop.f32.mrb[30].mxu1 }
 0x12b   : > { %v1484_v36 = vpack.c.bf16 %v888_v5, %v888_v5  ;;  %993 = vst.msk [vmem:[%s2170_s22 + $0x8] sm:$0xf] %vm990_vm3, %v1491_v19  ;;  %v1492_v29 = vpack.c.bf16 %v912_v2, %v912_v2  ;;  %v863_v42 = vadd.f32 %v1602_v23, %v1977_v15  ;;  %v679_v44 = vadd.f32 %v1982_v16, %v678_v39  ;;  %v681_v7 = vpop.f32.mrb[31].mxu0  ;;  %v857_v54 = vpop.f32.mrb[31].mxu1 }
 0x12c   : > { %950 = vst.msk [vmem:[%s2162_s16] sm:$0xf] %vm949_vm2, %v1481_v8  ;;  %v1482_v32 = vpack.c.bf16 %v886_v11, %v886_v11  ;;  %v1490_v22 = vpack.c.bf16 %v910_v61, %v910_v61  ;;  %v855_v63 = vadd.f32 %v1977_v15, %v854_v6  ;;  %v883_v4 = vmax.f32 %v2121_v46, %v687_v26 }
 0x12d   : > { %991 = vst.msk [vmem:[%s2170_s22] sm:$0xf] %vm990_vm3, %v1489_v33  ;;  %v690_v31 = vadd.f32 %v1569_v12, %v1982_v16  ;;  %994 = vst.msk [vmem:[%s2170_s22 + $0xc] sm:$0xf] %vm990_vm3, %v1492_v29  ;;  %v907_v37 = vmax.f32 %v2127_v28, %v863_v42  ;;  %v866_v14 = vadd.f32 %v1603_v60, %v1977_v15 }
 0x12e   : > { %953 = vst.msk [vmem:[%s2162_s16 + $0xc] sm:$0xf] %vm949_vm2, %v1484_v36  ;;  %951 = vst.msk [vmem:[%s2162_s16 + $0x4] sm:$0xf] %vm949_vm2, %v1482_v32  ;;  %v881_v13 = vmax.f32 %v2124_v25, %v679_v44  ;;  %v682_v45 = vadd.f32 %v1982_v16, %v681_v7  ;;  %v905_v46 = vmax.f32 %v2130_v34, %v855_v63 }
 0x12f   : > { %992 = vst.msk [vmem:[%s2170_s22 + $0x4] sm:$0xf] %vm990_vm3, %v1490_v22  ;;  %v858_v20 = vadd.f32 %v1977_v15, %v857_v54  ;;  %v2336_v40 = vmax.f32 %v2052_v50, %v2064_v56  ;;  %v884_v28 = vmax.f32 %v2133_v52, %v690_v31  ;;  %v2337_v35 = vmax.f32 %v2049_v49, %v2070_v59 }
 0x130   : > { %v908_v16 = vmax.f32 %v2137_v57, %v866_v14  ;;  %v2338_v25 = vmax.f32 %v2055_v51, %v2076_v62  ;;  %v882_v15 = vmax.f32 %v2141_v43, %v682_v45  ;;  %v2339_v50 = vmax.f32 %v2058_v53, %v2082_v1  ;;  %v2341_v51 = vld [vmem:[#allocation7_spill] sm:$0xff]  ;;  %v2343_v53 = vld [vmem:[#allocation5_spill] sm:$0xff]  ;;  %v2344_v1 = vld [vmem:[#allocation8_spill] sm:$0xff] }
 0x131   : > { %v891_v9 = vmax.f32 %v2336_v40, %v883_v4  ;;  %v915_v38 = vmax.f32 %v2337_v35, %v907_v37  ;;  %v906_v52 = vmax.f32 %v2145_v41, %v858_v20  ;;  %v2340_v49 = vmax.f32 %v2061_v55, %v2087_v3 }
 0x132   : > { %v889_v34 = vmax.f32 %v2338_v25, %v881_v13  ;;  %v913_v56 = vmax.f32 %v2339_v50, %v905_v46  ;;  %v2342_v62 = vmax.f32 %v2067_v58, %v2341_v51  ;;  %v2345_v18 = vmax.f32 %v2343_v53, %v2344_v1 }
 0x133   : > { %v1487_v0 = vpack.c.bf16 %v891_v9, %v891_v9  ;;  %v892_v59 = vmax.f32 %v2340_v49, %v884_v28  ;;  %v1495_v57 = vpack.c.bf16 %v915_v38, %v915_v38  ;;  %v2348_v5 = vmax.f32 %v2346_v27, %v2347_v48 }
 0x134   : > { %v916_v43 = vmax.f32 %v2342_v62, %v908_v16  ;;  %v1485_v17 = vpack.c.bf16 %v889_v34, %v889_v34  ;;  %v890_v24 = vmax.f32 %v2345_v18, %v882_v15  ;;  %v1493_v41 = vpack.c.bf16 %v913_v56, %v913_v56 }
 0x135   : > { %v914_v55 = vmax.f32 %v2348_v5, %v906_v52  ;;  %956 = vst.msk [vmem:[%s2162_s16 + $0x18] sm:$0xf] %vm949_vm2, %v1487_v0  ;;  %v1488_v3 = vpack.c.bf16 %v892_v59, %v892_v59 }
 0x136   : > { %997 = vst.msk [vmem:[%s2170_s22 + $0x18] sm:$0xf] %vm990_vm3, %v1495_v57  ;;  %v1496_v19 = vpack.c.bf16 %v916_v43, %v916_v43  ;;  %v1486_v58 = vpack.c.bf16 %v890_v24, %v890_v24  ;;  %995 = vst.msk [vmem:[%s2170_s22 + $0x10] sm:$0xf] %vm990_vm3, %v1493_v41 }
 0x137   : > { %954 = vst.msk [vmem:[%s2162_s16 + $0x10] sm:$0xf] %vm949_vm2, %v1485_v17  ;;  %v1494_v30 = vpack.c.bf16 %v914_v55, %v914_v55  ;;  %957 = vst.msk [vmem:[%s2162_s16 + $0x1c] sm:$0xf] %vm949_vm2, %v1488_v3 }
 0x138   : > { %998 = vst.msk [vmem:[%s2170_s22 + $0x1c] sm:$0xf] %vm990_vm3, %v1496_v19 }
 0x139   : > { %955 = vst.msk [vmem:[%s2162_s16 + $0x14] sm:$0xf] %vm949_vm2, %v1486_v58  ;;  %s1699_s16 = scalar_lea.vmem %s2266_s27, 16 }
 0x13a   : > { %996 = vst.msk [vmem:[%s2170_s22 + $0x14] sm:$0xf] %vm990_vm3, %v1494_v30  ;;  %p1700_p11 = scmp.ne.s32.totalorder %s2266_s27, %s1699_s16  ;;  %p1707_p1 = scmp.lt.s32.totalorder %s1705_s21, %s1699_s16 }
 0x13c   : > { %p1701_p12 = pnand %p1700_p11, %p1855_p5  ;;  %p1708_p2 = por %p1707_p1, %p1706_p0 }
 0x13e   : > { %v1173_v2 = vpop.f32.mrb[32].mxu0  ;;  %p1702_p13 = pneg %p1701_p12 }
 0x13f   : > { %v1177_v8 = vmax.f32 %v1173_v2, 0.0  ;;  %v1610_v10 = vpop.f32.mrb[33].mxu0 }
 0x140   : > { %p1709_p3 = pnand %p1708_p2, %p1702_p13 }
 0x141   : > { %1614 = vmatmul.mubr.msk.f32.vlgmr.msra.gmra.mrb[32].mxu1 %vm1179_vm4, %v1177_v8 }
 0x214   : > { %v1249_v11 = vpop.f32.mrb[32].mxu1 }
 0x215   : > { %v1253_v21 = vsub.f32 0.0, %v1249_v11  ;;  %v1615_v33 = vpop.f32.mrb[33].mxu1 }
 0x217   : > { %v1254_v47 = vmul.f32 1.442695, %v1253_v21 }
 0x219   : > { %1695 = vpow2.f32 %v1254_v47 }
 0x223   : > { %v1696_v61 = vpop.eup %1695 }
 0x224   : > { %v1256_v23 = vadd.f32 1.0, %v1696_v61 }
 0x226   : > { %1697 = vrcp.f32 %v1256_v23 }
 0x230   : > { %v1698_v36 = vpop.eup %1697 }
 0x231   : > { %1260 = vst.msk [vmem:[%s339_s26] sm:$0x1] %vm1259_vm5, %v1698_v36 }
 0x232   : > { %1712 = shalt.err (!%p1709_p3)
}
 0x233   : > { %s1713_s22 = scalar_lea.hbm %s2264_s23, 16  ;;  %s1717_s26 = scalar_lea.hbm %s2315_s9, 32 }
 0x234   : > { %p1714_p4 = scmp.ne.s32.totalorder %s2264_s23, %s1713_s22  ;;  %p1718_p9 = scmp.lt.u32.totalorder %s2264_s23, %s2315_s9 }
 0x235   : > { %p1719_p10 = scmp.lt.u32.totalorder %s1717_s26, %s1713_s22  ;;  %p1721_p12 = scmp.lt.u32.totalorder %s1713_s22, %s2264_s23 }
 0x236   : > { %p1715_p7 = pnand %p1714_p4, %p1855_p5 }
 0x237   : > { %p1720_p11 = por %p1719_p10, %p1718_p9 }
 0x238   : > { %p1716_p8 = pneg %p1715_p7 }
 0x239   : > { %p1722_p13 = por %p1721_p12, %p1720_p11 }
 0x23b   : > { %p1723_p0 = pnand %p1722_p13, %p1716_p8 }
 0x23d   : > { %1726 = shalt.err (!%p1723_p0)
}
 0x23e   : > { %1619 = dma.vmem_to_hbm [thread:$0]  (%p1855_p5), %s2266_s27, 16, %s2264_s23, %s1272_s14  }
 0x23f PF: > { %p1625_p1 = scmp.ge.s32.totalorder %s1761_s12, 2  ;;  %s1318_s16 = sand.u32 1, %s1749_s30  }
 0x240   : > { %s1319_s13 = scalar_lea.sflag [#allocation3], %s1318_s16 }
 0x241   : > { %p1622_p2 = pnand %p1625_p1, %p1859_p6 }
 0x243   : > { %1744 = dma.done.wait (!%p1622_p2), %s1319_s13, 16  }
 0x244   : > { %1746 = vsyncadd (!%p1622_p2), %s1319_s13, 4294967280  ;;  %p20_p3 = scmp.ge.s32.totalorder %s1842_s15, 4   ;;  %s2349_s30 = smov %s1753_s10 }
 0x245   : > { %s2350_s10 = smov %s1757_s11  ;;  %s2351_s11 = smov %s1853_s18 }
 0x246   : > { %s2352_s12 = smov %s1842_s15  ;;  %22 = sbr.rel (!%p20_p3) target bundleno = 3 (0x3), region = 107 }
 0x24d   :  { %1323 = vsyncpa [#allocation3], 1 }
 0x24e   :  { %1325 = vsyncpa [#allocation3 + $0x1], 1 }

</bundles_post_ra>
